<compile_context>
chip_gen: v5e
topology: v5e:2x2
jax: 0.10.0
libtpu: 0.0.40
codegen_flags: <defaults>
</compile_context>

<pallas_src>
import numpy as np
import jax
import jax.numpy as jnp
from jax.experimental import pallas as pl
from jax.experimental.pallas import tpu as pltpu


# ----------------------------------------------------------------------------
# Fused Pallas kernel
# ----------------------------------------------------------------------------

def _cnn1d_lc_kernel(x_ref, z_ref, rep_ref,
                     m1_ref, c1b_ref, m2_ref, c2b_ref,
                     wx_ref, wz_ref, bin_ref,
                     wih_ref, whh_ref, blstm_ref,
                     wout_ref, bout_ref,
                     out_ref,
                     hall_ref):
    f32 = jnp.float32
    TB = x_ref.shape[0]
    B = z_ref.shape[0]
    H = whh_ref.shape[0]
    T = TB // B

    # ---- CNN feature extractor: Conv1d layers as dense (Toeplitz) matmuls + ReLU ----
    z = z_ref[...]                                                           # (B, nobs)
    a1 = jnp.dot(z, m1_ref[...], preferred_element_type=f32) + c1b_ref[...]
    a1 = jnp.maximum(a1, 0.0)                                                # (B, C1*L1)
    z0 = jnp.dot(a1, m2_ref[...], preferred_element_type=f32) + c2b_ref[...]
    z0 = jnp.maximum(z0, 0.0)                                                # (B, N_cnn_out)

    # ---- linearIn over cat((x, z0), dim=2): split weights, ReLU ----
    zc = jnp.dot(z0, wz_ref[...], preferred_element_type=f32) + bin_ref[...]  # (B, H)
    xc = jnp.dot(x_ref[...], wx_ref[...], preferred_element_type=f32)         # (T*B, H)
    zc_rep = jnp.dot(rep_ref[...], zc, preferred_element_type=f32)            # (T*B, H)
    x1 = jnp.maximum(xc + zc_rep, 0.0)                                        # (T*B, H)

    # ---- hoisted LSTM input projection: ONE (T*B,H) x (H,4H) matmul, bias folded in ----
    gx = jnp.dot(x1, wih_ref[...], preferred_element_type=f32) + blstm_ref[...]  # (T*B, 4H)

    # ---- recurrence: statically unrolled, only h @ W_hh on the serial chain ----
    whh = whh_ref[...]
    h = jnp.zeros((B, H), f32)
    c = jnp.zeros((B, H), f32)
    for t in range(T):                       # trace-time unroll (T is small and static)
        gates = gx[t * B:(t + 1) * B, :] + jnp.dot(h, whh, preferred_element_type=f32)
        sig = jax.nn.sigmoid(gates)          # one EUP pass over the full 4H-lane tile
        tah = jnp.tanh(gates)
        i_g = sig[:, 0 * H:1 * H]
        f_g = sig[:, 1 * H:2 * H]
        g_g = tah[:, 2 * H:3 * H]
        o_g = sig[:, 3 * H:4 * H]
        c = f_g * c + i_g * g_g
        h = o_g * jnp.tanh(c)
        hall_ref[t * B:(t + 1) * B, :] = h   # aligned (B,H) store into VMEM scratch

    # ---- linearOut: single matmul, single output store ----
    out_ref[...] = (jnp.dot(hall_ref[...], wout_ref[...], preferred_element_type=f32)
                    + bout_ref[...])


# ----------------------------------------------------------------------------
# Wrapper
# ----------------------------------------------------------------------------

_VMEM = pl.BlockSpec(memory_space=pltpu.MemorySpace.VMEM)


def cnn1d_lc_forward(x, z, params):
    """Fused CNN1dLCmodel forward (eval mode).

    x: (rho, bs, nx) time-major, z: (nobs, n_grid) with n_grid == bs.
    Returns (rho, bs, ny).
    """
    T, B, nx = x.shape
    H = params["w_hh_t"].shape[0]
    ny = params["lin_out_w"].shape[1]

    x2d = x.reshape(T * B, nx)
    zt = z.T                                                       # (n_grid, nobs)
    # 0/1 matrix replicating per-grid CNN features across time via one tiny matmul.
    rep = jnp.tile(jnp.eye(B, dtype=jnp.float32), (T, 1))          # (T*B, B)

    out2d = pl.pallas_call(
        _cnn1d_lc_kernel,
        out_shape=jax.ShapeDtypeStruct((T * B, ny), jnp.float32),
        in_specs=[_VMEM] * 15,
        out_specs=_VMEM,
        scratch_shapes=[pltpu.VMEM((T * B, H), jnp.float32)],      # per-step h (lane/sublane aligned)
    )(x2d, zt, rep,
      params["cnn_m1"], params["cnn_b1"], params["cnn_m2"], params["cnn_b2"],
      params["lin_in_wx"], params["lin_in_wz"], params["lin_in_b"],
      params["w_ih_t"], params["w_hh_t"], params["lstm_b"],
      params["lin_out_w"], params["lin_out_b"])
    return out2d.reshape(T, B, ny)


# ----------------------------------------------------------------------------
# Parameter init (deterministic; Conv1d weights converted to dense Toeplitz matrices)
# ----------------------------------------------------------------------------

def init_params(key, nx, ny, nobs, hidden_size,
                n_kernel=(10, 5), kernel_size=(3, 3), stride=(2, 1)):
    ks = jax.random.split(key, 12)
    f32 = jnp.float32

    def u(k, shape, fan):
        bound = 1.0 / np.sqrt(float(fan))
        return jax.random.uniform(k, shape, f32, -bound, bound)

    H = hidden_size
    C1, C2 = n_kernel
    K1, K2 = kernel_size
    s1, s2 = stride
    L1 = (nobs - K1) // s1 + 1
    L2 = (L1 - K2) // s2 + 1
    n_cnn_out = C2 * L2
    nf = nx + n_cnn_out

    # Raw Conv1d parameters (torch layout: (C_out, C_in, K)).
    w1 = u(ks[0], (C1, 1, K1), 1 * K1)
    b1 = u(ks[1], (C1,), 1 * K1)
    w2 = u(ks[2], (C2, C1, K2), C1 * K2)
    b2 = u(ks[3], (C2,), C1 * K2)

    # Dense (Toeplitz) equivalents: valid conv, stride s, channel-major flattening
    # (matches torch's .view(n_grid, N_cnn_out)).
    w1_np, w2_np = np.asarray(w1), np.asarray(w2)
    m1 = np.zeros((nobs, C1, L1), np.float32)
    for p in range(L1):
        for k in range(K1):
            m1[p * s1 + k, :, p] = w1_np[:, 0, k]
    m2 = np.zeros((C1, L1, C2, L2), np.float32)
    for p in range(L2):
        for k in range(K2):
            m2[:, p * s2 + k, :, p] = w2_np[:, :, k].T
    cnn_m1 = jnp.asarray(m1.reshape(nobs, C1 * L1))
    cnn_b1 = jnp.repeat(b1, L1)[None, :]
    cnn_m2 = jnp.asarray(m2.reshape(C1 * L1, C2 * L2))
    cnn_b2 = jnp.repeat(b2, L2)[None, :]

    # linearIn (nf -> H), stored transposed; split into x-columns and cnn-columns
    # (feature order of torch.cat((x, z0), dim=2)).
    w_in = u(ks[4], (nf, H), nf)
    b_in = u(ks[5], (1, H), nf)

    # CudnnLstm (input_size=H, hidden=H): gate order i,f,g,o; b = b_ih + b_hh.
    w_ih_t = u(ks[6], (H, 4 * H), H)
    w_hh_t = u(ks[7], (H, 4 * H), H)
    lstm_b = u(ks[8], (1, 4 * H), H) + u(ks[9], (1, 4 * H), H)

    # linearOut (H -> ny)
    w_out = u(ks[10], (H, ny), H)
    b_out = u(ks[11], (1, ny), H)

    params = {
        "cnn_m1": cnn_m1, "cnn_b1": cnn_b1, "cnn_m2": cnn_m2, "cnn_b2": cnn_b2,
        "lin_in_wx": w_in[:nx, :], "lin_in_wz": w_in[nx:, :], "lin_in_b": b_in,
        "w_ih_t": w_ih_t, "w_hh_t": w_hh_t, "lstm_b": lstm_b,
        "lin_out_w": w_out, "lin_out_b": b_out,
    }
    raw = {   # raw-form parameters for the pure-JAX reference
        "w1": w1, "b1": b1, "w2": w2, "b2": b2, "s1": s1, "s2": s2,
        "w_in_t": w_in, "b_in": b_in,
        "w_ih_t": w_ih_t, "w_hh_t": w_hh_t, "lstm_b": lstm_b,
        "w_out_t": w_out, "b_out": b_out,
    }
    return params, raw


# ----------------------------------------------------------------------------
# Pure-JAX reference (mirrors the PyTorch forward, eval mode)
# ----------------------------------------------------------------------------

def reference_forward(x, z, raw):
    T, B, _ = x.shape
    H = raw["w_hh_t"].shape[0]
    dn = ("NCH", "OIH", "NCH")

    zt = z.T[:, None, :]                                             # (n_grid, 1, nobs)
    a = jax.lax.conv_general_dilated(zt, raw["w1"], (raw["s1"],), "VALID", dimension_numbers=dn)
    a = jnp.maximum(a + raw["b1"][None, :, None], 0.0)
    a = jax.lax.conv_general_dilated(a, raw["w2"], (raw["s2"],), "VALID", dimension_numbers=dn)
    a = jnp.maximum(a + raw["b2"][None, :, None], 0.0)
    z0 = a.reshape(B, -1)                                            # (n_grid, N_cnn_out)

    z0r = jnp.broadcast_to(z0[None], (T, B, z0.shape[-1]))
    xcat = jnp.concatenate([x, z0r], axis=2)
    x1 = jnp.maximum(jnp.einsum("tbf,fh->tbh", xcat, raw["w_in_t"]) + raw["b_in"], 0.0)

    def step(carry, xt):
        h, c = carry
        g = xt @ raw["w_ih_t"] + h @ raw["w_hh_t"] + raw["lstm_b"]
        i = jax.nn.sigmoid(g[:, :H])
        f = jax.nn.sigmoid(g[:, H:2 * H])
        gg = jnp.tanh(g[:, 2 * H:3 * H])
        o = jax.nn.sigmoid(g[:, 3 * H:])
        c = f * c + i * gg
        h = o * jnp.tanh(c)
        return (h, c), h

    init = (jnp.zeros((B, H), jnp.float32), jnp.zeros((B, H), jnp.float32))
    _, hs = jax.lax.scan(step, init, x1)
    return jnp.einsum("tbh,hn->tbn", hs, raw["w_out_t"]) + raw["b_out"]


# ----------------------------------------------------------------------------

if __name__ == "__main__":
    T, B = 8, 8              # rho (seq len), batch == n_grid (8 keeps sublane tiles aligned)
    nx = 5                   # n_var
    nobs = 16                # observation-series length fed to the CNN
    hidden_size = 32
    ny = 2

    key = jax.random.PRNGKey(0)
    kx, kz, kp = jax.random.split(key, 3)
    x = jax.random.normal(kx, (T, B, nx), jnp.float32)
    z = jax.random.normal(kz, (nobs, B), jnp.float32)    # forward transposes, like torch's z.t()

    params, raw = init_params(kp, nx, ny, nobs, hidden_size)

    fwd = jax.jit(cnn1d_lc_forward)
    out = fwd(x, z, params)
    jax.block_until_ready(out)
    assert out.shape == (T, B, ny)

    ref = reference_forward(x, z, raw)
    assert jnp.allclose(out, ref, atol=2e-3, rtol=2e-3), float(jnp.max(jnp.abs(out - ref)))

    print("KERNEL_OK")
</pallas_src>

<mosaic_0001>
module attributes {stable_mosaic.version = 11 : i64} {
  func.func @_cnn1d_lc_kernel(%arg0: memref<64x5xf32, #tpu.memory_space<vmem>>, %arg1: memref<8x16xf32, #tpu.memory_space<vmem>>, %arg2: memref<64x8xf32, #tpu.memory_space<vmem>>, %arg3: memref<16x70xf32, #tpu.memory_space<vmem>>, %arg4: memref<1x70xf32, #tpu.memory_space<vmem>>, %arg5: memref<70x25xf32, #tpu.memory_space<vmem>>, %arg6: memref<1x25xf32, #tpu.memory_space<vmem>>, %arg7: memref<5x32xf32, #tpu.memory_space<vmem>>, %arg8: memref<25x32xf32, #tpu.memory_space<vmem>>, %arg9: memref<1x32xf32, #tpu.memory_space<vmem>>, %arg10: memref<32x128xf32, #tpu.memory_space<vmem>>, %arg11: memref<32x128xf32, #tpu.memory_space<vmem>>, %arg12: memref<1x128xf32, #tpu.memory_space<vmem>>, %arg13: memref<32x2xf32, #tpu.memory_space<vmem>>, %arg14: memref<1x2xf32, #tpu.memory_space<vmem>>, %arg15: memref<64x2xf32, #tpu.memory_space<vmem>>, %arg16: memref<64x32xf32, #tpu.memory_space<vmem>>) attributes {dimension_semantics = [], scalar_prefetch = 0 : i64, scratch_operands = 1 : i64, tpu.core_type = #tpu.core_type<tc>} {
    %c0 = arith.constant 0 : index
    %c0_0 = arith.constant 0 : index
    %0 = vector.load %arg1[%c0, %c0_0] : memref<8x16xf32, #tpu.memory_space<vmem>>, vector<8x16xf32>
    %c0_1 = arith.constant 0 : index
    %c0_2 = arith.constant 0 : index
    %1 = vector.load %arg3[%c0_1, %c0_2] : memref<16x70xf32, #tpu.memory_space<vmem>>, vector<16x70xf32>
    %cst = arith.constant dense<0.000000e+00> : vector<8x70xf32>
    %2 = tpu.matmul %0, %1, %cst {dimension_numbers = #tpu.dot_dimension_numbers<[1], [0], [0], [1], [0, 0, 1, 1], [], []>} : vector<8x16xf32>, vector<16x70xf32>, vector<8x70xf32> -> vector<8x70xf32>
    %c0_3 = arith.constant 0 : index
    %c0_4 = arith.constant 0 : index
    %3 = vector.load %arg4[%c0_3, %c0_4] : memref<1x70xf32, #tpu.memory_space<vmem>>, vector<1x70xf32>
    %4 = vector.broadcast %3 : vector<1x70xf32> to vector<8x70xf32>
    %5 = arith.addf %2, %4 : vector<8x70xf32>
    %cst_5 = arith.constant 0.000000e+00 : f32
    %6 = vector.broadcast %cst_5 : f32 to vector<8x70xf32>
    %7 = arith.maximumf %5, %6 : vector<8x70xf32>
    %c0_6 = arith.constant 0 : index
    %c0_7 = arith.constant 0 : index
    %8 = vector.load %arg5[%c0_6, %c0_7] : memref<70x25xf32, #tpu.memory_space<vmem>>, vector<70x25xf32>
    %cst_8 = arith.constant dense<0.000000e+00> : vector<8x25xf32>
    %9 = tpu.matmul %7, %8, %cst_8 {dimension_numbers = #tpu.dot_dimension_numbers<[1], [0], [0], [1], [0, 0, 1, 1], [], []>} : vector<8x70xf32>, vector<70x25xf32>, vector<8x25xf32> -> vector<8x25xf32>
    %c0_9 = arith.constant 0 : index
    %c0_10 = arith.constant 0 : index
    %10 = vector.load %arg6[%c0_9, %c0_10] : memref<1x25xf32, #tpu.memory_space<vmem>>, vector<1x25xf32>
    %11 = vector.broadcast %10 : vector<1x25xf32> to vector<8x25xf32>
    %12 = arith.addf %9, %11 : vector<8x25xf32>
    %cst_11 = arith.constant 0.000000e+00 : f32
    %13 = vector.broadcast %cst_11 : f32 to vector<8x25xf32>
    %14 = arith.maximumf %12, %13 : vector<8x25xf32>
    %c0_12 = arith.constant 0 : index
    %c0_13 = arith.constant 0 : index
    %15 = vector.load %arg8[%c0_12, %c0_13] : memref<25x32xf32, #tpu.memory_space<vmem>>, vector<25x32xf32>
    %cst_14 = arith.constant dense<0.000000e+00> : vector<8x32xf32>
    %16 = tpu.matmul %14, %15, %cst_14 {dimension_numbers = #tpu.dot_dimension_numbers<[1], [0], [0], [1], [0, 0, 1, 1], [], []>} : vector<8x25xf32>, vector<25x32xf32>, vector<8x32xf32> -> vector<8x32xf32>
    %c0_15 = arith.constant 0 : index
    %c0_16 = arith.constant 0 : index
    %17 = vector.load %arg9[%c0_15, %c0_16] : memref<1x32xf32, #tpu.memory_space<vmem>>, vector<1x32xf32>
    %18 = vector.broadcast %17 : vector<1x32xf32> to vector<8x32xf32>
    %19 = arith.addf %16, %18 : vector<8x32xf32>
    %c0_17 = arith.constant 0 : index
    %c0_18 = arith.constant 0 : index
    %20 = vector.load %arg0[%c0_17, %c0_18] : memref<64x5xf32, #tpu.memory_space<vmem>>, vector<64x5xf32>
    %c0_19 = arith.constant 0 : index
    %c0_20 = arith.constant 0 : index
    %21 = vector.load %arg7[%c0_19, %c0_20] : memref<5x32xf32, #tpu.memory_space<vmem>>, vector<5x32xf32>
    %cst_21 = arith.constant dense<0.000000e+00> : vector<64x32xf32>
    %22 = tpu.matmul %20, %21, %cst_21 {dimension_numbers = #tpu.dot_dimension_numbers<[1], [0], [0], [1], [0, 0, 1, 1], [], []>} : vector<64x5xf32>, vector<5x32xf32>, vector<64x32xf32> -> vector<64x32xf32>
    %c0_22 = arith.constant 0 : index
    %c0_23 = arith.constant 0 : index
    %23 = vector.load %arg2[%c0_22, %c0_23] : memref<64x8xf32, #tpu.memory_space<vmem>>, vector<64x8xf32>
    %cst_24 = arith.constant dense<0.000000e+00> : vector<64x32xf32>
    %24 = tpu.matmul %23, %19, %cst_24 {dimension_numbers = #tpu.dot_dimension_numbers<[1], [0], [0], [1], [0, 0, 1, 1], [], []>} : vector<64x8xf32>, vector<8x32xf32>, vector<64x32xf32> -> vector<64x32xf32>
    %25 = arith.addf %22, %24 : vector<64x32xf32>
    %cst_25 = arith.constant 0.000000e+00 : f32
    %26 = vector.broadcast %cst_25 : f32 to vector<64x32xf32>
    %27 = arith.maximumf %25, %26 : vector<64x32xf32>
    %c0_26 = arith.constant 0 : index
    %c0_27 = arith.constant 0 : index
    %28 = vector.load %arg10[%c0_26, %c0_27] : memref<32x128xf32, #tpu.memory_space<vmem>>, vector<32x128xf32>
    %cst_28 = arith.constant dense<0.000000e+00> : vector<64x128xf32>
    %29 = tpu.matmul %27, %28, %cst_28 {dimension_numbers = #tpu.dot_dimension_numbers<[1], [0], [0], [1], [0, 0, 1, 1], [], []>} : vector<64x32xf32>, vector<32x128xf32>, vector<64x128xf32> -> vector<64x128xf32>
    %c0_29 = arith.constant 0 : index
    %c0_30 = arith.constant 0 : index
    %30 = vector.load %arg12[%c0_29, %c0_30] : memref<1x128xf32, #tpu.memory_space<vmem>>, vector<1x128xf32>
    %31 = vector.broadcast %30 : vector<1x128xf32> to vector<64x128xf32>
    %32 = arith.addf %29, %31 : vector<64x128xf32>
    %c0_31 = arith.constant 0 : index
    %c0_32 = arith.constant 0 : index
    %33 = vector.load %arg11[%c0_31, %c0_32] : memref<32x128xf32, #tpu.memory_space<vmem>>, vector<32x128xf32>
    %cst_33 = arith.constant 0.000000e+00 : f32
    %34 = vector.broadcast %cst_33 : f32 to vector<8x32xf32>
    %cst_34 = arith.constant 0.000000e+00 : f32
    %35 = vector.broadcast %cst_34 : f32 to vector<8x32xf32>
    %36 = vector.extract_strided_slice %32 {offsets = [0, 0], sizes = [8, 128], strides = [1, 1]} : vector<64x128xf32> to vector<8x128xf32>
    %cst_35 = arith.constant dense<0.000000e+00> : vector<8x128xf32>
    %37 = tpu.matmul %34, %33, %cst_35 {dimension_numbers = #tpu.dot_dimension_numbers<[1], [0], [0], [1], [0, 0, 1, 1], [], []>} : vector<8x32xf32>, vector<32x128xf32>, vector<8x128xf32> -> vector<8x128xf32>
    %38 = arith.addf %36, %37 : vector<8x128xf32>
    %39 = arith.negf %38 : vector<8x128xf32>
    %40 = math.exp %39 : vector<8x128xf32>
    %cst_36 = arith.constant 1.000000e+00 : f32
    %41 = vector.broadcast %cst_36 : f32 to vector<8x128xf32>
    %42 = arith.addf %41, %40 : vector<8x128xf32>
    %43 = arith.divf %41, %42 : vector<8x128xf32>
    %44 = math.tanh %38 : vector<8x128xf32>
    %45 = vector.extract_strided_slice %43 {offsets = [0, 0], sizes = [8, 32], strides = [1, 1]} : vector<8x128xf32> to vector<8x32xf32>
    %46 = vector.extract_strided_slice %43 {offsets = [0, 32], sizes = [8, 32], strides = [1, 1]} : vector<8x128xf32> to vector<8x32xf32>
    %47 = vector.extract_strided_slice %44 {offsets = [0, 64], sizes = [8, 32], strides = [1, 1]} : vector<8x128xf32> to vector<8x32xf32>
    %48 = vector.extract_strided_slice %43 {offsets = [0, 96], sizes = [8, 32], strides = [1, 1]} : vector<8x128xf32> to vector<8x32xf32>
    %49 = arith.mulf %46, %35 : vector<8x32xf32>
    %50 = arith.mulf %45, %47 : vector<8x32xf32>
    %51 = arith.addf %49, %50 : vector<8x32xf32>
    %52 = math.tanh %51 : vector<8x32xf32>
    %53 = arith.mulf %48, %52 : vector<8x32xf32>
    %c0_37 = arith.constant 0 : index
    %c0_38 = arith.constant 0 : index
    %54 = vector.load %arg16[%c0_37, %c0_38] : memref<64x32xf32, #tpu.memory_space<vmem>>, vector<8x32xf32>
    tpu.vector_store %arg16[%c0_37, %c0_38], %53 {strides = array<i32>} : memref<64x32xf32, #tpu.memory_space<vmem>>, vector<8x32xf32>,
    %55 = vector.extract_strided_slice %32 {offsets = [8, 0], sizes = [8, 128], strides = [1, 1]} : vector<64x128xf32> to vector<8x128xf32>
    %cst_39 = arith.constant dense<0.000000e+00> : vector<8x128xf32>
    %56 = tpu.matmul %53, %33, %cst_39 {dimension_numbers = #tpu.dot_dimension_numbers<[1], [0], [0], [1], [0, 0, 1, 1], [], []>} : vector<8x32xf32>, vector<32x128xf32>, vector<8x128xf32> -> vector<8x128xf32>
    %57 = arith.addf %55, %56 : vector<8x128xf32>
    %58 = arith.negf %57 : vector<8x128xf32>
    %59 = math.exp %58 : vector<8x128xf32>
    %cst_40 = arith.constant 1.000000e+00 : f32
    %60 = vector.broadcast %cst_40 : f32 to vector<8x128xf32>
    %61 = arith.addf %60, %59 : vector<8x128xf32>
    %62 = arith.divf %60, %61 : vector<8x128xf32>
    %63 = math.tanh %57 : vector<8x128xf32>
    %64 = vector.extract_strided_slice %62 {offsets = [0, 0], sizes = [8, 32], strides = [1, 1]} : vector<8x128xf32> to vector<8x32xf32>
    %65 = vector.extract_strided_slice %62 {offsets = [0, 32], sizes = [8, 32], strides = [1, 1]} : vector<8x128xf32> to vector<8x32xf32>
    %66 = vector.extract_strided_slice %63 {offsets = [0, 64], sizes = [8, 32], strides = [1, 1]} : vector<8x128xf32> to vector<8x32xf32>
    %67 = vector.extract_strided_slice %62 {offsets = [0, 96], sizes = [8, 32], strides = [1, 1]} : vector<8x128xf32> to vector<8x32xf32>
    %68 = arith.mulf %65, %51 : vector<8x32xf32>
    %69 = arith.mulf %64, %66 : vector<8x32xf32>
    %70 = arith.addf %68, %69 : vector<8x32xf32>
    %71 = math.tanh %70 : vector<8x32xf32>
    %72 = arith.mulf %67, %71 : vector<8x32xf32>
    %c8 = arith.constant 8 : index
    %c0_41 = arith.constant 0 : index
    %73 = vector.load %arg16[%c8, %c0_41] : memref<64x32xf32, #tpu.memory_space<vmem>>, vector<8x32xf32>
    tpu.vector_store %arg16[%c8, %c0_41], %72 {strides = array<i32>} : memref<64x32xf32, #tpu.memory_space<vmem>>, vector<8x32xf32>,
    %74 = vector.extract_strided_slice %32 {offsets = [16, 0], sizes = [8, 128], strides = [1, 1]} : vector<64x128xf32> to vector<8x128xf32>
    %cst_42 = arith.constant dense<0.000000e+00> : vector<8x128xf32>
    %75 = tpu.matmul %72, %33, %cst_42 {dimension_numbers = #tpu.dot_dimension_numbers<[1], [0], [0], [1], [0, 0, 1, 1], [], []>} : vector<8x32xf32>, vector<32x128xf32>, vector<8x128xf32> -> vector<8x128xf32>
    %76 = arith.addf %74, %75 : vector<8x128xf32>
    %77 = arith.negf %76 : vector<8x128xf32>
    %78 = math.exp %77 : vector<8x128xf32>
    %cst_43 = arith.constant 1.000000e+00 : f32
    %79 = vector.broadcast %cst_43 : f32 to vector<8x128xf32>
    %80 = arith.addf %79, %78 : vector<8x128xf32>
    %81 = arith.divf %79, %80 : vector<8x128xf32>
    %82 = math.tanh %76 : vector<8x128xf32>
    %83 = vector.extract_strided_slice %81 {offsets = [0, 0], sizes = [8, 32], strides = [1, 1]} : vector<8x128xf32> to vector<8x32xf32>
    %84 = vector.extract_strided_slice %81 {offsets = [0, 32], sizes = [8, 32], strides = [1, 1]} : vector<8x128xf32> to vector<8x32xf32>
    %85 = vector.extract_strided_slice %82 {offsets = [0, 64], sizes = [8, 32], strides = [1, 1]} : vector<8x128xf32> to vector<8x32xf32>
    %86 = vector.extract_strided_slice %81 {offsets = [0, 96], sizes = [8, 32], strides = [1, 1]} : vector<8x128xf32> to vector<8x32xf32>
    %87 = arith.mulf %84, %70 : vector<8x32xf32>
    %88 = arith.mulf %83, %85 : vector<8x32xf32>
    %89 = arith.addf %87, %88 : vector<8x32xf32>
    %90 = math.tanh %89 : vector<8x32xf32>
    %91 = arith.mulf %86, %90 : vector<8x32xf32>
    %c16 = arith.constant 16 : index
    %c0_44 = arith.constant 0 : index
    %92 = vector.load %arg16[%c16, %c0_44] : memref<64x32xf32, #tpu.memory_space<vmem>>, vector<8x32xf32>
    tpu.vector_store %arg16[%c16, %c0_44], %91 {strides = array<i32>} : memref<64x32xf32, #tpu.memory_space<vmem>>, vector<8x32xf32>,
    %93 = vector.extract_strided_slice %32 {offsets = [24, 0], sizes = [8, 128], strides = [1, 1]} : vector<64x128xf32> to vector<8x128xf32>
    %cst_45 = arith.constant dense<0.000000e+00> : vector<8x128xf32>
    %94 = tpu.matmul %91, %33, %cst_45 {dimension_numbers = #tpu.dot_dimension_numbers<[1], [0], [0], [1], [0, 0, 1, 1], [], []>} : vector<8x32xf32>, vector<32x128xf32>, vector<8x128xf32> -> vector<8x128xf32>
    %95 = arith.addf %93, %94 : vector<8x128xf32>
    %96 = arith.negf %95 : vector<8x128xf32>
    %97 = math.exp %96 : vector<8x128xf32>
    %cst_46 = arith.constant 1.000000e+00 : f32
    %98 = vector.broadcast %cst_46 : f32 to vector<8x128xf32>
    %99 = arith.addf %98, %97 : vector<8x128xf32>
    %100 = arith.divf %98, %99 : vector<8x128xf32>
    %101 = math.tanh %95 : vector<8x128xf32>
    %102 = vector.extract_strided_slice %100 {offsets = [0, 0], sizes = [8, 32], strides = [1, 1]} : vector<8x128xf32> to vector<8x32xf32>
    %103 = vector.extract_strided_slice %100 {offsets = [0, 32], sizes = [8, 32], strides = [1, 1]} : vector<8x128xf32> to vector<8x32xf32>
    %104 = vector.extract_strided_slice %101 {offsets = [0, 64], sizes = [8, 32], strides = [1, 1]} : vector<8x128xf32> to vector<8x32xf32>
    %105 = vector.extract_strided_slice %100 {offsets = [0, 96], sizes = [8, 32], strides = [1, 1]} : vector<8x128xf32> to vector<8x32xf32>
    %106 = arith.mulf %103, %89 : vector<8x32xf32>
    %107 = arith.mulf %102, %104 : vector<8x32xf32>
    %108 = arith.addf %106, %107 : vector<8x32xf32>
    %109 = math.tanh %108 : vector<8x32xf32>
    %110 = arith.mulf %105, %109 : vector<8x32xf32>
    %c24 = arith.constant 24 : index
    %c0_47 = arith.constant 0 : index
    %111 = vector.load %arg16[%c24, %c0_47] : memref<64x32xf32, #tpu.memory_space<vmem>>, vector<8x32xf32>
    tpu.vector_store %arg16[%c24, %c0_47], %110 {strides = array<i32>} : memref<64x32xf32, #tpu.memory_space<vmem>>, vector<8x32xf32>,
    %112 = vector.extract_strided_slice %32 {offsets = [32, 0], sizes = [8, 128], strides = [1, 1]} : vector<64x128xf32> to vector<8x128xf32>
    %cst_48 = arith.constant dense<0.000000e+00> : vector<8x128xf32>
    %113 = tpu.matmul %110, %33, %cst_48 {dimension_numbers = #tpu.dot_dimension_numbers<[1], [0], [0], [1], [0, 0, 1, 1], [], []>} : vector<8x32xf32>, vector<32x128xf32>, vector<8x128xf32> -> vector<8x128xf32>
    %114 = arith.addf %112, %113 : vector<8x128xf32>
    %115 = arith.negf %114 : vector<8x128xf32>
    %116 = math.exp %115 : vector<8x128xf32>
    %cst_49 = arith.constant 1.000000e+00 : f32
    %117 = vector.broadcast %cst_49 : f32 to vector<8x128xf32>
    %118 = arith.addf %117, %116 : vector<8x128xf32>
    %119 = arith.divf %117, %118 : vector<8x128xf32>
    %120 = math.tanh %114 : vector<8x128xf32>
    %121 = vector.extract_strided_slice %119 {offsets = [0, 0], sizes = [8, 32], strides = [1, 1]} : vector<8x128xf32> to vector<8x32xf32>
    %122 = vector.extract_strided_slice %119 {offsets = [0, 32], sizes = [8, 32], strides = [1, 1]} : vector<8x128xf32> to vector<8x32xf32>
    %123 = vector.extract_strided_slice %120 {offsets = [0, 64], sizes = [8, 32], strides = [1, 1]} : vector<8x128xf32> to vector<8x32xf32>
    %124 = vector.extract_strided_slice %119 {offsets = [0, 96], sizes = [8, 32], strides = [1, 1]} : vector<8x128xf32> to vector<8x32xf32>
    %125 = arith.mulf %122, %108 : vector<8x32xf32>
    %126 = arith.mulf %121, %123 : vector<8x32xf32>
    %127 = arith.addf %125, %126 : vector<8x32xf32>
    %128 = math.tanh %127 : vector<8x32xf32>
    %129 = arith.mulf %124, %128 : vector<8x32xf32>
    %c32 = arith.constant 32 : index
    %c0_50 = arith.constant 0 : index
    %130 = vector.load %arg16[%c32, %c0_50] : memref<64x32xf32, #tpu.memory_space<vmem>>, vector<8x32xf32>
    tpu.vector_store %arg16[%c32, %c0_50], %129 {strides = array<i32>} : memref<64x32xf32, #tpu.memory_space<vmem>>, vector<8x32xf32>,
    %131 = vector.extract_strided_slice %32 {offsets = [40, 0], sizes = [8, 128], strides = [1, 1]} : vector<64x128xf32> to vector<8x128xf32>
    %cst_51 = arith.constant dense<0.000000e+00> : vector<8x128xf32>
    %132 = tpu.matmul %129, %33, %cst_51 {dimension_numbers = #tpu.dot_dimension_numbers<[1], [0], [0], [1], [0, 0, 1, 1], [], []>} : vector<8x32xf32>, vector<32x128xf32>, vector<8x128xf32> -> vector<8x128xf32>
    %133 = arith.addf %131, %132 : vector<8x128xf32>
    %134 = arith.negf %133 : vector<8x128xf32>
    %135 = math.exp %134 : vector<8x128xf32>
    %cst_52 = arith.constant 1.000000e+00 : f32
    %136 = vector.broadcast %cst_52 : f32 to vector<8x128xf32>
    %137 = arith.addf %136, %135 : vector<8x128xf32>
    %138 = arith.divf %136, %137 : vector<8x128xf32>
    %139 = math.tanh %133 : vector<8x128xf32>
    %140 = vector.extract_strided_slice %138 {offsets = [0, 0], sizes = [8, 32], strides = [1, 1]} : vector<8x128xf32> to vector<8x32xf32>
    %141 = vector.extract_strided_slice %138 {offsets = [0, 32], sizes = [8, 32], strides = [1, 1]} : vector<8x128xf32> to vector<8x32xf32>
    %142 = vector.extract_strided_slice %139 {offsets = [0, 64], sizes = [8, 32], strides = [1, 1]} : vector<8x128xf32> to vector<8x32xf32>
    %143 = vector.extract_strided_slice %138 {offsets = [0, 96], sizes = [8, 32], strides = [1, 1]} : vector<8x128xf32> to vector<8x32xf32>
    %144 = arith.mulf %141, %127 : vector<8x32xf32>
    %145 = arith.mulf %140, %142 : vector<8x32xf32>
    %146 = arith.addf %144, %145 : vector<8x32xf32>
    %147 = math.tanh %146 : vector<8x32xf32>
    %148 = arith.mulf %143, %147 : vector<8x32xf32>
    %c40 = arith.constant 40 : index
    %c0_53 = arith.constant 0 : index
    %149 = vector.load %arg16[%c40, %c0_53] : memref<64x32xf32, #tpu.memory_space<vmem>>, vector<8x32xf32>
    tpu.vector_store %arg16[%c40, %c0_53], %148 {strides = array<i32>} : memref<64x32xf32, #tpu.memory_space<vmem>>, vector<8x32xf32>,
    %150 = vector.extract_strided_slice %32 {offsets = [48, 0], sizes = [8, 128], strides = [1, 1]} : vector<64x128xf32> to vector<8x128xf32>
    %cst_54 = arith.constant dense<0.000000e+00> : vector<8x128xf32>
    %151 = tpu.matmul %148, %33, %cst_54 {dimension_numbers = #tpu.dot_dimension_numbers<[1], [0], [0], [1], [0, 0, 1, 1], [], []>} : vector<8x32xf32>, vector<32x128xf32>, vector<8x128xf32> -> vector<8x128xf32>
    %152 = arith.addf %150, %151 : vector<8x128xf32>
    %153 = arith.negf %152 : vector<8x128xf32>
    %154 = math.exp %153 : vector<8x128xf32>
    %cst_55 = arith.constant 1.000000e+00 : f32
    %155 = vector.broadcast %cst_55 : f32 to vector<8x128xf32>
    %156 = arith.addf %155, %154 : vector<8x128xf32>
    %157 = arith.divf %155, %156 : vector<8x128xf32>
    %158 = math.tanh %152 : vector<8x128xf32>
    %159 = vector.extract_strided_slice %157 {offsets = [0, 0], sizes = [8, 32], strides = [1, 1]} : vector<8x128xf32> to vector<8x32xf32>
    %160 = vector.extract_strided_slice %157 {offsets = [0, 32], sizes = [8, 32], strides = [1, 1]} : vector<8x128xf32> to vector<8x32xf32>
    %161 = vector.extract_strided_slice %158 {offsets = [0, 64], sizes = [8, 32], strides = [1, 1]} : vector<8x128xf32> to vector<8x32xf32>
    %162 = vector.extract_strided_slice %157 {offsets = [0, 96], sizes = [8, 32], strides = [1, 1]} : vector<8x128xf32> to vector<8x32xf32>
    %163 = arith.mulf %160, %146 : vector<8x32xf32>
    %164 = arith.mulf %159, %161 : vector<8x32xf32>
    %165 = arith.addf %163, %164 : vector<8x32xf32>
    %166 = math.tanh %165 : vector<8x32xf32>
    %167 = arith.mulf %162, %166 : vector<8x32xf32>
    %c48 = arith.constant 48 : index
    %c0_56 = arith.constant 0 : index
    %168 = vector.load %arg16[%c48, %c0_56] : memref<64x32xf32, #tpu.memory_space<vmem>>, vector<8x32xf32>
    tpu.vector_store %arg16[%c48, %c0_56], %167 {strides = array<i32>} : memref<64x32xf32, #tpu.memory_space<vmem>>, vector<8x32xf32>,
    %169 = vector.extract_strided_slice %32 {offsets = [56, 0], sizes = [8, 128], strides = [1, 1]} : vector<64x128xf32> to vector<8x128xf32>
    %cst_57 = arith.constant dense<0.000000e+00> : vector<8x128xf32>
    %170 = tpu.matmul %167, %33, %cst_57 {dimension_numbers = #tpu.dot_dimension_numbers<[1], [0], [0], [1], [0, 0, 1, 1], [], []>} : vector<8x32xf32>, vector<32x128xf32>, vector<8x128xf32> -> vector<8x128xf32>
    %171 = arith.addf %169, %170 : vector<8x128xf32>
    %172 = arith.negf %171 : vector<8x128xf32>
    %173 = math.exp %172 : vector<8x128xf32>
    %cst_58 = arith.constant 1.000000e+00 : f32
    %174 = vector.broadcast %cst_58 : f32 to vector<8x128xf32>
    %175 = arith.addf %174, %173 : vector<8x128xf32>
    %176 = arith.divf %174, %175 : vector<8x128xf32>
    %177 = math.tanh %171 : vector<8x128xf32>
    %178 = vector.extract_strided_slice %176 {offsets = [0, 0], sizes = [8, 32], strides = [1, 1]} : vector<8x128xf32> to vector<8x32xf32>
    %179 = vector.extract_strided_slice %176 {offsets = [0, 32], sizes = [8, 32], strides = [1, 1]} : vector<8x128xf32> to vector<8x32xf32>
    %180 = vector.extract_strided_slice %177 {offsets = [0, 64], sizes = [8, 32], strides = [1, 1]} : vector<8x128xf32> to vector<8x32xf32>
    %181 = vector.extract_strided_slice %176 {offsets = [0, 96], sizes = [8, 32], strides = [1, 1]} : vector<8x128xf32> to vector<8x32xf32>
    %182 = arith.mulf %179, %165 : vector<8x32xf32>
    %183 = arith.mulf %178, %180 : vector<8x32xf32>
    %184 = arith.addf %182, %183 : vector<8x32xf32>
    %185 = math.tanh %184 : vector<8x32xf32>
    %186 = arith.mulf %181, %185 : vector<8x32xf32>
    %c56 = arith.constant 56 : index
    %c0_59 = arith.constant 0 : index
    %187 = vector.load %arg16[%c56, %c0_59] : memref<64x32xf32, #tpu.memory_space<vmem>>, vector<8x32xf32>
    tpu.vector_store %arg16[%c56, %c0_59], %186 {strides = array<i32>} : memref<64x32xf32, #tpu.memory_space<vmem>>, vector<8x32xf32>,
    %c0_60 = arith.constant 0 : index
    %c0_61 = arith.constant 0 : index
    %188 = vector.load %arg16[%c0_60, %c0_61] : memref<64x32xf32, #tpu.memory_space<vmem>>, vector<64x32xf32>
    %c0_62 = arith.constant 0 : index
    %c0_63 = arith.constant 0 : index
    %189 = vector.load %arg13[%c0_62, %c0_63] : memref<32x2xf32, #tpu.memory_space<vmem>>, vector<32x2xf32>
    %cst_64 = arith.constant dense<0.000000e+00> : vector<64x2xf32>
    %190 = tpu.matmul %188, %189, %cst_64 {dimension_numbers = #tpu.dot_dimension_numbers<[1], [0], [0], [1], [0, 0, 1, 1], [], []>} : vector<64x32xf32>, vector<32x2xf32>, vector<64x2xf32> -> vector<64x2xf32>
    %c0_65 = arith.constant 0 : index
    %c0_66 = arith.constant 0 : index
    %191 = vector.load %arg14[%c0_65, %c0_66] : memref<1x2xf32, #tpu.memory_space<vmem>>, vector<1x2xf32>
    %192 = vector.broadcast %191 : vector<1x2xf32> to vector<64x2xf32>
    %193 = arith.addf %190, %192 : vector<64x2xf32>
    %c0_67 = arith.constant 0 : index
    %c0_68 = arith.constant 0 : index
    %194 = vector.load %arg15[%c0_67, %c0_68] : memref<64x2xf32, #tpu.memory_space<vmem>>, vector<64x2xf32>
    tpu.vector_store %arg15[%c0_67, %c0_68], %193 {strides = array<i32>} : memref<64x2xf32, #tpu.memory_space<vmem>>, vector<64x2xf32>,
    return
  }
}

</mosaic_0001>

<bundles_post_ra>
// kernel: cnn1d_lc_forward.1
= control target key start
LH: loop header
LB: loop body
LE: loop exit
PB: predicated region body
PF: predicated region fallthrough
CT: control target
= control target key end

     0   :  { %vm57_vm0 = vcmask 130048   ;;  %vm99_vm1 = vcmask 1045504   ;;  %vm136_vm2 = vcmask 1040384   ;;  %vm95_vm3 = vcmask 572416   ;;  %s1558_s3 = inlined_call_operand.vmem [shape: f32[16,70], index: 3, kind: input, shape index: {}]   ;;  %s1559_s1 = inlined_call_operand.vmem [shape: f32[8,16], index: 1, kind: input, shape index: {}]   ;;  %s1560_s5 = inlined_call_operand.vmem [shape: f32[70,25], index: 5, kind: input, shape index: {}]   ;;  %s1561_s4 = inlined_call_operand.vmem [shape: f32[1,70], index: 4, kind: input, shape index: {}]   ;;  %s1562_s6 = inlined_call_operand.vmem [shape: f32[1,25], index: 6, kind: input, shape index: {}]   ;;  %s1563_s8 = inlined_call_operand.vmem [shape: f32[25,32], index: 8, kind: input, shape index: {}]   ;;  %s1564_s9 = inlined_call_operand.vmem [shape: f32[1,32], index: 9, kind: input, shape index: {}]   ;;  %s1565_s2 = inlined_call_operand.vmem [shape: f32[64,8], index: 2, kind: input, shape index: {}]   ;;  %s1566_s7 = inlined_call_operand.vmem [shape: f32[5,32], index: 7, kind: input, shape index: {}]   ;;  %s1567_s0 = inlined_call_operand.vmem [shape: f32[64,5], index: 0, kind: input, shape index: {}]   ;;  %s1568_s10 = inlined_call_operand.vmem [shape: f32[32,128], index: 10, kind: input, shape index: {}]   ;;  %s1569_s11 = inlined_call_operand.vmem [shape: f32[32,128], index: 11, kind: input, shape index: {}]   ;;  %s1570_s12 = inlined_call_operand.vmem [shape: f32[1,128], index: 12, kind: input, shape index: {}]   ;;  %s1571_s13 = inlined_call_operand.vmem [shape: f32[32,2], index: 13, kind: input, shape index: {}]   ;;  %s1572_s14 = inlined_call_operand.vmem [shape: f32[1,2], index: 14, kind: input, shape index: {}]   ;;  %s1573_s15 = inlined_call_operand.vmem [shape: f32[64,2], index: 15, kind: output, shape index: {}]  }
   0x1   :  { %v52_v0 = vld [vmem:[%s1558_s3 + $0x8] sm:$0xff]  ;;  %v51_v1 = vld [vmem:[%s1558_s3] sm:$0xff]  ;;  %v89_v4 = vld [vmem:[%s1560_s5 + $0x38] sm:$0xff]  ;;  %vm132_vm4 = vcmask 203776   ;;  %vm177_vm5 = vcmask 64512   ;;  %vm268_vm6 = vcmask 1044480  }
   0x2   :  { %75 = vmatpush.msra.mxu1 %v52_v0  ;;  %v50_v2 = vld [vmem:[%s1559_s1] sm:$0xff]  ;;  %v88_v5 = vld [vmem:[%s1560_s5 + $0x30] sm:$0xff]  ;;  %v87_v6 = vld [vmem:[%s1560_s5 + $0x28] sm:$0xff]  ;;  %vm243_vm7 = vcmask 39936   ;;  %v1141_v47 = vmov 0.0   ;;  %vm329_vm8 = vcmask 261120  }
   0x3   :  { %v90_v3 = vld [vmem:[%s1560_s5 + $0x40] sm:$0x3f]  ;;  %v85_v8 = vld [vmem:[%s1560_s5 + $0x18] sm:$0xff]  ;;  %v84_v9 = vld [vmem:[%s1560_s5 + $0x10] sm:$0xff]  ;;  %vm1001_vm13 = vcmask 15360  }
   0x4   :  { %76 = vmatpush.msra.mxu1 %v51_v1  ;;  %v86_v7 = vld [vmem:[%s1560_s5 + $0x20] sm:$0xff]  ;;  %v83_v10 = vld [vmem:[%s1560_s5 + $0x8] sm:$0xff]  ;;  %v127_v12 = vld [vmem:[%s1563_s8 + $0x18] sm:$0x1] }
   0x5   :  { %1014 = vmatmul.msk.f32.vlgmr.msra.gmra.mxu1 %vm57_vm0, %v50_v2  ;;  %v82_v11 = vld [vmem:[%s1560_s5] sm:$0xff]  ;;  %1017 = vmatpush.msk.msra.mxu2 %vm136_vm2, %v127_v12  ;;  %v126_v17 = vld [vmem:[%s1563_s8 + $0x10] sm:$0xff]  ;;  %v125_v18 = vld [vmem:[%s1563_s8 + $0x8] sm:$0xff]  ;;  %s1142_s5 = smov 64  }
   0x6   :  { %1015 = vmatpush.msk.msrb.mxu1 %vm99_vm1, %v90_v3  ;;  %v1072_v13 = vld [vmem:[%s1561_s4] ss:$0 sm:$0xff]  ;;  %v170_v29 = vld [vmem:[%s1565_s2 + $0x8] sm:$0xff]  ;;  %v171_v30 = vld [vmem:[%s1565_s2 + $0x10] sm:$0xff] }
   0x7   :  { %153 = vmatpush.msra.mxu2 %v126_v17  ;;  %v124_v19 = vld [vmem:[%s1563_s8] sm:$0xff]  ;;  %v161_v32 = vld [vmem:[%s1567_s0 + $0x8] sm:$0xff]  ;;  %v162_v33 = vld [vmem:[%s1567_s0 + $0x10] sm:$0xff] }
   0x8   :  { %111 = vmatpush.msrb.mxu1 %v89_v4  ;;  %v1073_v20 = vld [vmem:[%s1562_s6] ss:$0 sm:$0xff]  ;;  %v172_v34 = vld [vmem:[%s1565_s2 + $0x18] sm:$0xff]  ;;  %v323_v36 = vld [vmem:[%s1568_s10 + $0x10] sm:$0xff] }
   0x9   :  { %154 = vmatpush.msra.mxu2 %v125_v18  ;;  %v1074_v24 = vld [vmem:[%s1564_s9] ss:$0 sm:$0xff]  ;;  %v324_v35 = vld [vmem:[%s1568_s10 + $0x18] sm:$0xff]  ;;  %v322_v39 = vld [vmem:[%s1568_s10 + $0x8] sm:$0xff] }
   0xa   :  { %112 = vmatpush.msrb.mxu1 %v88_v5  ;;  %v169_v27 = vld [vmem:[%s1565_s2] sm:$0xff]  ;;  %v163_v37 = vld [vmem:[%s1567_s0 + $0x18] sm:$0xff]  ;;  %v1344_v43 = vld [vmem:[%s1569_s11 + $0x10] sm:$0xff] }
   0xb   :  { %155 = vmatpush.msra.mxu2 %v124_v19  ;;  %v168_v28 = vld [vmem:[%s1566_s7] sm:$0x1f]  ;;  %v1339_v42 = vld [vmem:[%s1569_s11 + $0x18] sm:$0xff]  ;;  %v1351_v45 = vld [vmem:[%s1569_s11 + $0x8] sm:$0xff] }
   0xc   :  { %113 = vmatpush.msrb.mxu1 %v87_v6  ;;  %v160_v31 = vld [vmem:[%s1567_s0] sm:$0xff] }
   0xd   :  { %v173_v38 = vld [vmem:[%s1565_s2 + $0x20] sm:$0xff] }
   0xe   :  { %114 = vmatpush.msrb.mxu1 %v86_v7  ;;  %v321_v40 = vld [vmem:[%s1568_s10] sm:$0xff] }
   0xf   :  { %v164_v41 = vld [vmem:[%s1567_s0 + $0x20] sm:$0xff] }
  0x10   :  { %115 = vmatpush.msrb.mxu1 %v85_v8  ;;  %v1357_v46 = vld [vmem:[%s1569_s11] sm:$0xff] }
  0x11   :  { %v1376_v3 = vld [vmem:[%s1570_s12] ss:$0 sm:$0xff]  ;;  %s1143_s12 = smov 32  }
  0x12   :  { %116 = vmatpush.msrb.mxu1 %v84_v9 }
  0x14   :  { %117 = vmatpush.msrb.mxu1 %v83_v10 }
  0x16   :  { %118 = vmatpush.msrb.mxu1 %v82_v11 }
  0x18   :  { %414 = vmatpush.msra.mxu1 %v1339_v42 }
  0x1a   :  { %415 = vmatpush.msra.mxu1 %v1344_v43 }
  0x1c   :  { %416 = vmatpush.msra.mxu1 %v1351_v45 }
  0x1e   :  { %417 = vmatpush.msra.mxu1 %v1357_v46 }
  0x82   :  { %v78_v14 = vpop.f32.mrf.mxu1 }
  0x83   :  { %v79_v15 = vadd.f32 %v1072_v13, %v78_v14 }
  0x85   :  { %v81_v16 = vmax.f32 %v79_v15, 0.0 }
  0x87   :  { %1016 = vmatmul.msk.f32.vlgmr.msrb.gmra.mxu1 %vm95_vm3, %v81_v16 }
  0x88   :  { %479 = vmatpush.msrb.mxu1 %v1339_v42 }
  0x8a   :  { %480 = vmatpush.msrb.mxu1 %v1344_v43 }
  0x8c   :  { %481 = vmatpush.msrb.mxu1 %v1351_v45 }
  0x8e   :  { %482 = vmatpush.msrb.mxu1 %v1357_v46 }
  0x8f   :  { %418 = vmatmul.f32.vlgmr.msra.gmra.mxu1 %v1141_v47 }
  0x90   :  { %544 = vmatpush.msra.mxu1 %v1339_v42 }
  0x92   :  { %545 = vmatpush.msra.mxu1 %v1344_v43 }
  0x94   :  { %546 = vmatpush.msra.mxu1 %v1351_v45 }
  0x96   :  { %547 = vmatpush.msra.mxu1 %v1357_v46 }
 0x104   :  { %v120_v21 = vpop.f32.mrf.mxu1 }
 0x105   :  { %v121_v22 = vadd.f32 %v1073_v20, %v120_v21 }
 0x107   :  { %v123_v23 = vmax.f32 %v121_v22, 0.0 }
 0x109   :  { %1018 = vmatmul.msk.f32.vlgmr.msra.gmra.mxu2 %vm132_vm4, %v123_v23 }
 0x10c   :  { %v419_v5 = vpop.f32.mrf.mxu1 }
 0x18c   :  { %v157_v25 = vpop.f32.mrf.mxu2 }
 0x18d   :  { %v158_v26 = vadd.f32 %v1074_v24, %v157_v25 }
 0x18f   :  { %217 = vmatpush.msra.mxu0 %v158_v26  ;;  %1067 = vmatpush.msrb.mxu2 %v158_v26 }
 0x190   :  { %1068 = vmatpush.msra.mxu3 %v158_v26  ;;  %1019 = vmatmul.msk.f32.vlgmr.msra.gmra.mxu0 %vm177_vm5, %v169_v27 }
 0x191   :  { %1027 = vmatpush.msk.msrb.mxu0 %vm268_vm6, %v168_v28  ;;  %1022 = vmatmul.msk.f32.vlgmr.msrb.gmra.mxu2 %vm177_vm5, %v172_v34  ;;  %v174_v28 = vld [vmem:[%s1565_s2 + $0x28] sm:$0xff]  ;;  %v930_v34 = vld [vmem:[%s1571_s13 + $0x10] sm:$0xff] }
 0x192   :  { %366 = vmatpush.msra.mxu2 %v324_v35  ;;  %1024 = vmatmul.msk.f32.vlgmr.msra.gmra.mxu3 %vm177_vm5, %v174_v28  ;;  %v929_v35 = vld [vmem:[%s1571_s13 + $0x8] sm:$0xff] }
 0x194   :  { %367 = vmatpush.msra.mxu2 %v323_v36  ;;  %v928_v36 = vld [vmem:[%s1571_s13] sm:$0xff] }
 0x196   :  { %368 = vmatpush.msra.mxu2 %v322_v39 }
 0x198   :  { %1020 = vmatmul.msk.f32.gmra.mxu0 %vm177_vm5, %v170_v29  ;;  %369 = vmatpush.msra.mxu2 %v321_v40  ;;  %v175_v29 = vld [vmem:[%s1565_s2 + $0x30] sm:$0xff] }
 0x199   :  { %1023 = vmatmul.msk.f32.gmra.mxu2 %vm177_vm5, %v173_v38 }
 0x19a   :  { %1025 = vmatmul.msk.f32.gmra.mxu3 %vm177_vm5, %v175_v29 }
 0x1a0   :  { %1021 = vmatmul.msk.f32.gmra.mxu0 %vm177_vm5, %v171_v30 }
 0x1a8   :  { %1028 = vmatmul.msk.f32.vlgmr.msrb.gmra.mxu0 %vm243_vm7, %v160_v31 }
 0x1b0   :  { %1029 = vmatmul.msk.f32.gmra.mxu0 %vm243_vm7, %v161_v32  ;;  %v176_v32 = vld [vmem:[%s1565_s2 + $0x38] sm:$0xff] }
 0x1b1   :  { %1026 = vmatmul.msk.f32.gmra.mxu3 %vm177_vm5, %v176_v32 }
 0x1b8   :  { %1030 = vmatmul.msk.f32.gmra.mxu0 %vm243_vm7, %v162_v33  ;;  %v931_v33 = vld [vmem:[%s1571_s13 + $0x18] sm:$0xff] }
 0x1b9   :  { %972 = vmatpush.msrb.mxu3 %v931_v33 }
 0x1bb   :  { %973 = vmatpush.msrb.mxu3 %v930_v34 }
 0x1bd   :  { %974 = vmatpush.msrb.mxu3 %v929_v35 }
 0x1bf   :  { %975 = vmatpush.msrb.mxu3 %v928_v36 }
 0x1c0   :  { %1031 = vmatmul.msk.f32.gmra.mxu0 %vm243_vm7, %v163_v37 }
 0x1c8   :  { %1032 = vmatmul.msk.f32.gmra.mxu0 %vm243_vm7, %v164_v41 }
 0x20d   :  { %v219_v44 = vpop.f32.mrf.mxu0 }
 0x214   :  { %v228_v59 = vpop.f32.mrf.mxu2 }
 0x215   :  { %v222_v48 = vpop.f32.mrf.mxu0  ;;  %v1417_v39 = vpop.f32.mrf.mxu3 }
 0x21c   :  { %v231_v63 = vpop.f32.mrf.mxu2 }
 0x21d   :  { %v225_v49 = vpop.f32.mrf.mxu0  ;;  %v1419_v40 = vpop.f32.mrf.mxu3 }
 0x225   :  { %v289_v50 = vpop.f32.mrf.mxu0 }
 0x226   :  { %v290_v51 = vadd.f32 %v289_v50, %v219_v44 }
 0x228   :  { %v313_v52 = vmax.f32 %v290_v51, 0.0  ;;  %v1428_v51 = vld [vmem:[%s1572_s14] ss:$0 sm:$0xff] }
 0x22a   :  { %1036 = vmatmul.msk.f32.vlgmr.msra.gmra.mxu2 %vm329_vm8, %v313_v52 }
 0x22d   :  { %v292_v53 = vpop.f32.mrf.mxu0 }
 0x22e   :  { %v293_v54 = vadd.f32 %v292_v53, %v222_v48 }
 0x230   :  { %v314_v55 = vmax.f32 %v293_v54, 0.0 }
 0x232   :  { %1037 = vmatmul.msk.f32.gmra.mxu2 %vm329_vm8, %v314_v55 }
 0x235   :  { %v295_v56 = vpop.f32.mrf.mxu0 }
 0x236   :  { %v296_v57 = vadd.f32 %v295_v56, %v225_v49  ;;  %v1422_v49 = vpop.f32.mrf.mxu3 }
 0x238   :  { %v315_v58 = vmax.f32 %v296_v57, 0.0 }
 0x23a   :  { %1038 = vmatmul.msk.f32.gmra.mxu2 %vm329_vm8, %v315_v58 }
 0x23d   :  { %v298_v60 = vpop.f32.mrf.mxu0 }
 0x23e   :  { %v299_v61 = vadd.f32 %v298_v60, %v228_v59 }
 0x240   :  { %v316_v62 = vmax.f32 %v299_v61, 0.0 }
 0x242   :  { %1039 = vmatmul.msk.f32.gmra.mxu2 %vm329_vm8, %v316_v62 }
 0x245   :  { %v301_v0 = vpop.f32.mrf.mxu0 }
 0x246   :  { %v302_v1 = vadd.f32 %v301_v0, %v231_v63 }
 0x248   :  { %v317_v2 = vmax.f32 %v302_v1, 0.0 }
 0x24a   :  { %1040 = vmatmul.msk.f32.gmra.mxu2 %vm329_vm8, %v317_v2 }
 0x2ad   :  { %v371_v4 = vpop.f32.mrf.mxu2 }
 0x2ae   :  { %v372_v6 = vadd.f32 %v1376_v3, %v371_v4 }
 0x2b0   :  { %v422_v7 = vadd.f32 %v419_v5, %v372_v6 }
 0x2b2   :  { %1077 = vtanh.f32 %v422_v7  ;;  %v1044_v9 = vmul.f32 -1.442695, %v422_v7 }
 0x2b4   :  { %1079 = vpow2.f32 %v1044_v9 }
 0x2b5   :  { %v374_v41 = vpop.f32.mrf.mxu2 }
 0x2b6   :  { %v375_v44 = vadd.f32 %v1376_v3, %v374_v41 }
 0x2b8   :  { %v1078_v8 = vpop.eup %1077 }
 0x2b9   :  { %445 = vrot.lane.b32.xlu0 %v1078_v8, %s1142_s5 }
 0x2ba   :  { %v1080_v10 = vpop.eup %1079 }
 0x2bb   :  { %v426_v11 = vadd.f32 1.0, %v1080_v10 }
 0x2bd   :  { %1081 = vrcp.f32 %v426_v11  ;;  %v438_v17 = vand.u32 2147483648, %v426_v11  ;;  %vm432_vm10 = vweird.f32 %v426_v11  ;;  %v436_v18 = vand.u32 2147483647, %v426_v11 }
 0x2bf   :  { %v439_v20 = vor.u32 1.1754944e-38, %v438_v17  ;;  %vm437_vm12 = vcmp.eq.f32.partialorder %v436_v18, 8.507059e+37 }
 0x2c3   :  { %v1082_v12 = vpop.eup %1081 }
 0x2c4   :  { %v428_v13 = vmul.f32 %v1082_v12, %v426_v11  ;;  %vm433_vm9 = vweird.f32 %v1082_v12 }
 0x2c5   :  { %vm434_vm11 = vmor %vm432_vm10, %vm433_vm9 }
 0x2c6   :  { %v429_v14 = vsub.f32 1.0, %v428_v13 }
 0x2c8   :  { %v430_v15 = vmul.f32 %v1082_v12, %v429_v14  ;;  %v377_v14 = vpop.f32.mrf.mxu2 }
 0x2ca   :  { %v431_v16 = vadd.f32 %v1082_v12, %v430_v15  ;;  %v378_v15 = vadd.f32 %v1376_v3, %v377_v14 }
 0x2cc   :  { %v435_v19 = vsel %vm434_vm11, %v1082_v12, %v431_v16 }
 0x2cd   :  { %v440_v22 = vsel %vm437_vm12, %v439_v20, %v435_v19 }
 0x2ce   :  { %v443_v24 = vmul.f32 0.0, %v440_v22 }
 0x32b   :  { %v446_v21 = vpop.permute.xlu0 %445 }
 0x32c   :  { %v448_v23 = vmul.f32 %v446_v21, %v440_v22 }
 0x32e   :  { %450 = vrot.lane.b32.xlu0 %v448_v23, %s1143_s12 }
 0x3a0   :  { %v451_v25 = vpop.permute.xlu0 %450 }
 0x3a1   :  { %v1381_v26 = vadd.f32 %v451_v25, %v443_v24 }
 0x3a3   :  { %1083 = vtanh.f32 %v1381_v26 }
 0x3a9   :  { %v1084_v27 = vpop.eup %1083 }
 0x3aa   :  { %456 = vrot.lane.b32.xlu1 %v1084_v27, %s1142_s5 }
 0x41c   :  { %v457_v30 = vpop.permute.xlu1 %456 }
 0x41d   :  { %v459_v31 = vmul.f32 %v457_v30, %v440_v22 }
 0x41f   :  { %461 = vrot.lane.b32.xlu1 %v459_v31, %s1143_s12 }
 0x491   :  { %v462_v37 = vpop.permute.xlu1 %461 }
 0x492   :  { %464 = vst.msk [vmem:[#allocation2] sm:$0xff] %vm329_vm8, %v462_v37  ;;  %1045 = vmatmul.msk.f32.vlgmr.msrb.gmra.mxu1 %vm329_vm8, %v462_v37 }
 0x493   :  { %609 = vmatpush.msrb.mxu1 %v1339_v42 }
 0x495   :  { %610 = vmatpush.msrb.mxu1 %v1344_v43 }
 0x497   :  { %611 = vmatpush.msrb.mxu1 %v1351_v45 }
 0x499   :  { %v920_v38 = vld [vmem:[#allocation2] sm:$0xff]  ;;  %612 = vmatpush.msrb.mxu1 %v1357_v46 }
 0x49a   :  { %1059 = vmatmul.msk.f32.vlgmr.msrb.gmra.mxu3 %vm329_vm8, %v920_v38 }
 0x50f   :  { %v484_v47 = vpop.f32.mrf.mxu1 }
 0x510   :  { %v487_v48 = vadd.f32 %v484_v47, %v375_v44 }
 0x512   :  { %1085 = vtanh.f32 %v487_v48  ;;  %v1046_v54 = vmul.f32 -1.442695, %v487_v48 }
 0x514   :  { %1087 = vpow2.f32 %v1046_v54 }
 0x518   :  { %v1086_v50 = vpop.eup %1085 }
 0x519   :  { %510 = vrot.lane.b32.xlu2 %v1086_v50, %s1142_s5 }
 0x51a   :  { %v1088_v55 = vpop.eup %1087 }
 0x51b   :  { %v491_v56 = vadd.f32 1.0, %v1088_v55 }
 0x51d   :  { %v977_v52 = vpop.f32.mrf.mxu3  ;;  %1089 = vrcp.f32 %v491_v56  ;;  %v503_v62 = vand.u32 2147483648, %v491_v56  ;;  %vm497_vm15 = vweird.f32 %v491_v56  ;;  %v501_v63 = vand.u32 2147483647, %v491_v56 }
 0x51e   :  { %v978_v53 = vadd.f32 %v1428_v51, %v977_v52  ;;  %v380_v52 = vpop.f32.mrf.mxu2 }
 0x51f   :  { %v504_v1 = vor.u32 1.1754944e-38, %v503_v62  ;;  %vm502_vm1 = vcmp.eq.f32.partialorder %v501_v63, 8.507059e+37 }
 0x520   :  { %1002 = vst.msk [vmem:[%s1573_s15] sm:$0xff] %vm1001_vm13, %v978_v53  ;;  %v381_v53 = vadd.f32 %v1376_v3, %v380_v52 }
 0x523   :  { %v1090_v57 = vpop.eup %1089 }
 0x524   :  { %v493_v58 = vmul.f32 %v1090_v57, %v491_v56  ;;  %vm498_vm14 = vweird.f32 %v1090_v57 }
 0x525   :  { %vm499_vm0 = vmor %vm497_vm15, %vm498_vm14 }
 0x526   :  { %v494_v59 = vsub.f32 1.0, %v493_v58 }
 0x528   :  { %v495_v60 = vmul.f32 %v1090_v57, %v494_v59 }
 0x52a   :  { %v496_v61 = vadd.f32 %v1090_v57, %v495_v60 }
 0x52c   :  { %v500_v0 = vsel %vm499_vm0, %v1090_v57, %v496_v61 }
 0x52d   :  { %v505_v4 = vsel %vm502_vm1, %v504_v1, %v500_v0 }
 0x52e   :  { %v508_v6 = vmul.f32 %v505_v4, %v1381_v26 }
 0x573   :  { %v511_v2 = vpop.permute.xlu2 %510 }
 0x574   :  { %v513_v5 = vmul.f32 %v511_v2, %v505_v4 }
 0x576   :  { %515 = vrot.lane.b32.xlu2 %v513_v5, %s1143_s12 }
 0x5d0   :  { %v516_v7 = vpop.permute.xlu2 %515 }
 0x5d1   :  { %v518_v8 = vadd.f32 %v516_v7, %v508_v6 }
 0x5d3   :  { %1091 = vtanh.f32 %v518_v8 }
 0x5d9   :  { %v1092_v9 = vpop.eup %1091 }
 0x5da   :  { %521 = vrot.lane.b32.xlu0 %v1092_v9, %s1142_s5 }
 0x64c   :  { %v522_v10 = vpop.permute.xlu0 %521 }
 0x64d   :  { %v524_v11 = vmul.f32 %v522_v10, %v505_v4 }
 0x64f   :  { %526 = vrot.lane.b32.xlu1 %v524_v11, %s1143_s12 }
 0x6c1   :  { %v527_v12 = vpop.permute.xlu1 %526 }
 0x6c2   :  { %529 = vst.msk [vmem:[#allocation2 + $0x8] sm:$0xff] %vm329_vm8, %v527_v12  ;;  %1047 = vmatmul.msk.f32.vlgmr.msra.gmra.mxu1 %vm329_vm8, %v527_v12 }
 0x6c3   :  { %674 = vmatpush.msra.mxu1 %v1339_v42 }
 0x6c5   :  { %675 = vmatpush.msra.mxu1 %v1344_v43 }
 0x6c7   :  { %676 = vmatpush.msra.mxu1 %v1351_v45 }
 0x6c9   :  { %v921_v13 = vld [vmem:[#allocation2 + $0x8] sm:$0xff]  ;;  %677 = vmatpush.msra.mxu1 %v1357_v46 }
 0x6ca   :  { %1060 = vmatmul.msk.f32.gmra.mxu3 %vm329_vm8, %v921_v13 }
 0x73f   :  { %v549_v16 = vpop.f32.mrf.mxu1 }
 0x740   :  { %v552_v17 = vadd.f32 %v549_v16, %v378_v15 }
 0x742   :  { %1093 = vtanh.f32 %v552_v17  ;;  %v1048_v21 = vmul.f32 -1.442695, %v552_v17 }
 0x744   :  { %1095 = vpow2.f32 %v1048_v21 }
 0x748   :  { %v1094_v18 = vpop.eup %1093 }
 0x749   :  { %575 = vrot.lane.b32.xlu2 %v1094_v18, %s1142_s5 }
 0x74a   :  { %v1096_v22 = vpop.eup %1095 }
 0x74b   :  { %v556_v23 = vadd.f32 1.0, %v1096_v22 }
 0x74d   :  { %v980_v19 = vpop.f32.mrf.mxu3  ;;  %1097 = vrcp.f32 %v556_v23  ;;  %v568_v29 = vand.u32 2147483648, %v556_v23  ;;  %vm562_vm3 = vweird.f32 %v556_v23  ;;  %v566_v30 = vand.u32 2147483647, %v556_v23 }
 0x74e   :  { %v981_v20 = vadd.f32 %v1428_v51, %v980_v19  ;;  %v383_v19 = vpop.f32.mrf.mxu2 }
 0x74f   :  { %v569_v32 = vor.u32 1.1754944e-38, %v568_v29  ;;  %vm567_vm5 = vcmp.eq.f32.partialorder %v566_v30, 8.507059e+37 }
 0x750   :  { %1003 = vst.msk [vmem:[%s1573_s15 + $0x8] sm:$0xff] %vm1001_vm13, %v981_v20  ;;  %v384_v20 = vadd.f32 %v1376_v3, %v383_v19 }
 0x753   :  { %v1098_v24 = vpop.eup %1097 }
 0x754   :  { %v558_v25 = vmul.f32 %v1098_v24, %v556_v23  ;;  %vm563_vm2 = vweird.f32 %v1098_v24 }
 0x755   :  { %vm564_vm4 = vmor %vm562_vm3, %vm563_vm2 }
 0x756   :  { %v559_v26 = vsub.f32 1.0, %v558_v25 }
 0x758   :  { %v560_v27 = vmul.f32 %v1098_v24, %v559_v26 }
 0x75a   :  { %v561_v28 = vadd.f32 %v1098_v24, %v560_v27 }
 0x75c   :  { %v565_v31 = vsel %vm564_vm4, %v1098_v24, %v561_v28 }
 0x75d   :  { %v570_v34 = vsel %vm567_vm5, %v569_v32, %v565_v31 }
 0x75e   :  { %v573_v36 = vmul.f32 %v570_v34, %v518_v8 }
 0x7a3   :  { %v576_v33 = vpop.permute.xlu2 %575 }
 0x7a4   :  { %v578_v35 = vmul.f32 %v576_v33, %v570_v34 }
 0x7a6   :  { %580 = vrot.lane.b32.xlu0 %v578_v35, %s1143_s12 }
 0x818   :  { %v581_v37 = vpop.permute.xlu0 %580 }
 0x819   :  { %v583_v38 = vadd.f32 %v581_v37, %v573_v36 }
 0x81b   :  { %1099 = vtanh.f32 %v583_v38 }
 0x821   :  { %v1100_v41 = vpop.eup %1099 }
 0x822   :  { %586 = vrot.lane.b32.xlu1 %v1100_v41, %s1142_s5 }
 0x894   :  { %v587_v44 = vpop.permute.xlu1 %586 }
 0x895   :  { %v589_v47 = vmul.f32 %v587_v44, %v570_v34 }
 0x897   :  { %591 = vrot.lane.b32.xlu2 %v589_v47, %s1143_s12  ;;  %v165_v47 = vld [vmem:[%s1567_s0 + $0x28] sm:$0xff] }
 0x898   :  { %1033 = vmatmul.msk.f32.gmra.mxu0 %vm243_vm7, %v165_v47 }
 0x8f1   :  { %v592_v48 = vpop.permute.xlu2 %591 }
 0x8f2   :  { %594 = vst.msk [vmem:[#allocation2 + $0x10] sm:$0xff] %vm329_vm8, %v592_v48  ;;  %1049 = vmatmul.msk.f32.vlgmr.msrb.gmra.mxu1 %vm329_vm8, %v592_v48 }
 0x8f3   :  { %739 = vmatpush.msrb.mxu1 %v1339_v42 }
 0x8f5   :  { %740 = vmatpush.msrb.mxu1 %v1344_v43 }
 0x8f7   :  { %741 = vmatpush.msrb.mxu1 %v1351_v45 }
 0x8f9   :  { %v922_v50 = vld [vmem:[#allocation2 + $0x10] sm:$0xff]  ;;  %742 = vmatpush.msrb.mxu1 %v1357_v46 }
 0x8fa   :  { %1061 = vmatmul.msk.f32.gmra.mxu3 %vm329_vm8, %v922_v50 }
 0x96f   :  { %v614_v54 = vpop.f32.mrf.mxu1 }
 0x970   :  { %v617_v55 = vadd.f32 %v614_v54, %v381_v53  ;;  %v304_v54 = vpop.f32.mrf.mxu0 }
 0x972   :  { %1101 = vtanh.f32 %v617_v55  ;;  %v1050_v59 = vmul.f32 -1.442695, %v617_v55  ;;  %v305_v55 = vadd.f32 %v304_v54, %v1417_v39 }
 0x974   :  { %1103 = vpow2.f32 %v1050_v59 }
 0x978   :  { %v1102_v56 = vpop.eup %1101 }
 0x979   :  { %640 = vrot.lane.b32.xlu0 %v1102_v56, %s1142_s5  ;;  %v318_v56 = vmax.f32 %v305_v55, 0.0 }
 0x97a   :  { %v1104_v60 = vpop.eup %1103 }
 0x97b   :  { %v621_v61 = vadd.f32 1.0, %v1104_v60  ;;  %1041 = vmatmul.msk.f32.gmra.mxu2 %vm329_vm8, %v318_v56  ;;  %v167_v56 = vld [vmem:[%s1567_s0 + $0x38] sm:$0xff] }
 0x97d   :  { %v983_v57 = vpop.f32.mrf.mxu3  ;;  %1105 = vrcp.f32 %v621_v61  ;;  %v633_v4 = vand.u32 2147483648, %v621_v61  ;;  %vm627_vm9 = vweird.f32 %v621_v61  ;;  %v631_v5 = vand.u32 2147483647, %v621_v61 }
 0x97e   :  { %v984_v58 = vadd.f32 %v1428_v51, %v983_v57 }
 0x97f   :  { %v634_v7 = vor.u32 1.1754944e-38, %v633_v4  ;;  %vm632_vm11 = vcmp.eq.f32.partialorder %v631_v5, 8.507059e+37 }
 0x980   :  { %1004 = vst.msk [vmem:[%s1573_s15 + $0x10] sm:$0xff] %vm1001_vm13, %v984_v58 }
 0x983   :  { %v1106_v62 = vpop.eup %1105 }
 0x984   :  { %v623_v63 = vmul.f32 %v1106_v62, %v621_v61  ;;  %vm628_vm6 = vweird.f32 %v1106_v62 }
 0x985   :  { %vm629_vm10 = vmor %vm627_vm9, %vm628_vm6 }
 0x986   :  { %v624_v0 = vsub.f32 1.0, %v623_v63 }
 0x988   :  { %v625_v1 = vmul.f32 %v1106_v62, %v624_v0 }
 0x98a   :  { %v626_v2 = vadd.f32 %v1106_v62, %v625_v1 }
 0x98c   :  { %v630_v6 = vsel %vm629_vm10, %v1106_v62, %v626_v2 }
 0x98d   :  { %v635_v9 = vsel %vm632_vm11, %v634_v7, %v630_v6 }
 0x98e   :  { %v638_v11 = vmul.f32 %v635_v9, %v583_v38 }
 0x9eb   :  { %v641_v8 = vpop.permute.xlu0 %640 }
 0x9ec   :  { %v643_v10 = vmul.f32 %v641_v8, %v635_v9 }
 0x9ee   :  { %645 = vrot.lane.b32.xlu1 %v643_v10, %s1143_s12 }
 0x9fe   :  { %v386_v39 = vpop.f32.mrf.mxu2 }
 0x9ff   :  { %v387_v61 = vadd.f32 %v1376_v3, %v386_v39 }
 0xa60   :  { %v646_v12 = vpop.permute.xlu1 %645 }
 0xa61   :  { %v648_v13 = vadd.f32 %v646_v12, %v638_v11 }
 0xa63   :  { %1107 = vtanh.f32 %v648_v13 }
 0xa69   :  { %v1108_v14 = vpop.eup %1107 }
 0xa6a   :  { %651 = vrot.lane.b32.xlu2 %v1108_v14, %s1142_s5 }
 0xac4   :  { %v652_v15 = vpop.permute.xlu2 %651 }
 0xac5   :  { %v654_v16 = vmul.f32 %v652_v15, %v635_v9  ;;  %v166_v15 = vld [vmem:[%s1567_s0 + $0x30] sm:$0xff] }
 0xac6   :  { %1034 = vmatmul.msk.f32.gmra.mxu0 %vm243_vm7, %v166_v15 }
 0xac7   :  { %656 = vrot.lane.b32.xlu0 %v654_v16, %s1143_s12 }
 0xace   :  { %1035 = vmatmul.msk.f32.gmra.mxu0 %vm243_vm7, %v167_v56 }
 0xb39   :  { %v657_v17 = vpop.permute.xlu0 %656 }
 0xb3a   :  { %659 = vst.msk [vmem:[#allocation2 + $0x18] sm:$0xff] %vm329_vm8, %v657_v17  ;;  %1051 = vmatmul.msk.f32.vlgmr.msra.gmra.mxu1 %vm329_vm8, %v657_v17 }
 0xb3b   :  { %804 = vmatpush.msra.mxu1 %v1339_v42 }
 0xb3d   :  { %805 = vmatpush.msra.mxu1 %v1344_v43 }
 0xb3f   :  { %806 = vmatpush.msra.mxu1 %v1351_v45 }
 0xb41   :  { %v923_v18 = vld [vmem:[#allocation2 + $0x18] sm:$0xff]  ;;  %807 = vmatpush.msra.mxu1 %v1357_v46 }
 0xb42   :  { %1062 = vmatmul.msk.f32.gmra.mxu3 %vm329_vm8, %v923_v18 }
 0xbb7   :  { %v679_v21 = vpop.f32.mrf.mxu1 }
 0xbb8   :  { %v682_v22 = vadd.f32 %v679_v21, %v384_v20  ;;  %v307_v20 = vpop.f32.mrf.mxu0 }
 0xbb9   :  { %v308_v21 = vadd.f32 %v307_v20, %v1419_v40 }
 0xbba   :  { %1109 = vtanh.f32 %v682_v22  ;;  %v1052_v26 = vmul.f32 -1.442695, %v682_v22 }
 0xbbb   :  { %v319_v22 = vmax.f32 %v308_v21, 0.0 }
 0xbbc   :  { %1111 = vpow2.f32 %v1052_v26 }
 0xbbd   :  { %1042 = vmatmul.msk.f32.gmra.mxu2 %vm329_vm8, %v319_v22 }
 0xbc0   :  { %v1110_v23 = vpop.eup %1109 }
 0xbc1   :  { %705 = vrot.lane.b32.xlu1 %v1110_v23, %s1142_s5 }
 0xbc2   :  { %v1112_v27 = vpop.eup %1111 }
 0xbc3   :  { %v686_v28 = vadd.f32 1.0, %v1112_v27 }
 0xbc5   :  { %v986_v24 = vpop.f32.mrf.mxu3  ;;  %1113 = vrcp.f32 %v686_v28  ;;  %v698_v34 = vand.u32 2147483648, %v686_v28  ;;  %vm692_vm14 = vweird.f32 %v686_v28  ;;  %v696_v35 = vand.u32 2147483647, %v686_v28 }
 0xbc6   :  { %v987_v25 = vadd.f32 %v1428_v51, %v986_v24 }
 0xbc7   :  { %v699_v37 = vor.u32 1.1754944e-38, %v698_v34  ;;  %vm697_vm0 = vcmp.eq.f32.partialorder %v696_v35, 8.507059e+37 }
 0xbc8   :  { %1005 = vst.msk [vmem:[%s1573_s15 + $0x18] sm:$0xff] %vm1001_vm13, %v987_v25 }
 0xbcb   :  { %v1114_v29 = vpop.eup %1113 }
 0xbcc   :  { %v688_v30 = vmul.f32 %v1114_v29, %v686_v28  ;;  %vm693_vm12 = vweird.f32 %v1114_v29 }
 0xbcd   :  { %vm694_vm15 = vmor %vm692_vm14, %vm693_vm12 }
 0xbce   :  { %v689_v31 = vsub.f32 1.0, %v688_v30 }
 0xbd0   :  { %v690_v32 = vmul.f32 %v1114_v29, %v689_v31 }
 0xbd2   :  { %v691_v33 = vadd.f32 %v1114_v29, %v690_v32 }
 0xbd4   :  { %v695_v36 = vsel %vm694_vm15, %v1114_v29, %v691_v33 }
 0xbd5   :  { %v700_v41 = vsel %vm697_vm0, %v699_v37, %v695_v36 }
 0xbd6   :  { %v703_v48 = vmul.f32 %v700_v41, %v648_v13 }
 0xc33   :  { %v706_v38 = vpop.permute.xlu1 %705 }
 0xc34   :  { %v708_v44 = vmul.f32 %v706_v38, %v700_v41 }
 0xc36   :  { %710 = vrot.lane.b32.xlu2 %v708_v44, %s1143_s12 }
 0xc40   :  { %v389_v27 = vpop.f32.mrf.mxu2 }
 0xc41   :  { %v390_v28 = vadd.f32 %v1376_v3, %v389_v27 }
 0xc90   :  { %v711_v50 = vpop.permute.xlu2 %710 }
 0xc91   :  { %v713_v52 = vadd.f32 %v711_v50, %v703_v48 }
 0xc93   :  { %1115 = vtanh.f32 %v713_v52 }
 0xc99   :  { %v1116_v53 = vpop.eup %1115 }
 0xc9a   :  { %716 = vrot.lane.b32.xlu0 %v1116_v53, %s1142_s5 }
 0xd0c   :  { %v717_v57 = vpop.permute.xlu0 %716 }
 0xd0d   :  { %v719_v58 = vmul.f32 %v717_v57, %v700_v41 }
 0xd0f   :  { %721 = vrot.lane.b32.xlu1 %v719_v58, %s1143_s12 }
 0xd81   :  { %v722_v59 = vpop.permute.xlu1 %721 }
 0xd82   :  { %724 = vst.msk [vmem:[#allocation2 + $0x20] sm:$0xff] %vm329_vm8, %v722_v59  ;;  %1053 = vmatmul.msk.f32.vlgmr.msrb.gmra.mxu1 %vm329_vm8, %v722_v59 }
 0xd83   :  { %869 = vmatpush.msrb.mxu1 %v1339_v42 }
 0xd85   :  { %870 = vmatpush.msrb.mxu1 %v1344_v43 }
 0xd87   :  { %871 = vmatpush.msrb.mxu1 %v1351_v45 }
 0xd89   :  { %v924_v60 = vld [vmem:[#allocation2 + $0x20] sm:$0xff]  ;;  %872 = vmatpush.msrb.mxu1 %v1357_v46 }
 0xd8a   :  { %1063 = vmatmul.msk.f32.gmra.mxu3 %vm329_vm8, %v924_v60 }
 0xdff   :  { %v744_v62 = vpop.f32.mrf.mxu1 }
 0xe00   :  { %v747_v63 = vadd.f32 %v744_v62, %v387_v61  ;;  %v310_v62 = vpop.f32.mrf.mxu0 }
 0xe02   :  { %1117 = vtanh.f32 %v747_v63  ;;  %v1054_v43 = vmul.f32 -1.442695, %v747_v63  ;;  %v311_v63 = vadd.f32 %v310_v62, %v1422_v49 }
 0xe04   :  { %1119 = vpow2.f32 %v1054_v43 }
 0xe08   :  { %v1118_v0 = vpop.eup %1117 }
 0xe09   :  { %770 = vrot.lane.b32.xlu2 %v1118_v0, %s1142_s5  ;;  %v320_v0 = vmax.f32 %v311_v63, 0.0 }
 0xe0a   :  { %v1120_v45 = vpop.eup %1119 }
 0xe0b   :  { %v751_v46 = vadd.f32 1.0, %v1120_v45  ;;  %1043 = vmatmul.msk.f32.gmra.mxu2 %vm329_vm8, %v320_v0 }
 0xe0d   :  { %v989_v1 = vpop.f32.mrf.mxu3  ;;  %1121 = vrcp.f32 %v751_v46  ;;  %v763_v8 = vand.u32 2147483648, %v751_v46  ;;  %vm757_vm2 = vweird.f32 %v751_v46  ;;  %v761_v9 = vand.u32 2147483647, %v751_v46 }
 0xe0e   :  { %v990_v42 = vadd.f32 %v1428_v51, %v989_v1 }
 0xe0f   :  { %v764_v11 = vor.u32 1.1754944e-38, %v763_v8  ;;  %vm762_vm4 = vcmp.eq.f32.partialorder %v761_v9, 8.507059e+37 }
 0xe10   :  { %1006 = vst.msk [vmem:[%s1573_s15 + $0x20] sm:$0xff] %vm1001_vm13, %v990_v42 }
 0xe13   :  { %v1122_v2 = vpop.eup %1121 }
 0xe14   :  { %v753_v4 = vmul.f32 %v1122_v2, %v751_v46  ;;  %vm758_vm1 = vweird.f32 %v1122_v2 }
 0xe15   :  { %vm759_vm3 = vmor %vm757_vm2, %vm758_vm1 }
 0xe16   :  { %v754_v5 = vsub.f32 1.0, %v753_v4 }
 0xe18   :  { %v755_v6 = vmul.f32 %v1122_v2, %v754_v5 }
 0xe1a   :  { %v756_v7 = vadd.f32 %v1122_v2, %v755_v6 }
 0xe1c   :  { %v760_v10 = vsel %vm759_vm3, %v1122_v2, %v756_v7 }
 0xe1d   :  { %v765_v13 = vsel %vm762_vm4, %v764_v11, %v760_v10 }
 0xe1e   :  { %v768_v16 = vmul.f32 %v765_v13, %v713_v52 }
 0xe63   :  { %v771_v12 = vpop.permute.xlu2 %770 }
 0xe64   :  { %v773_v14 = vmul.f32 %v771_v12, %v765_v13 }
 0xe66   :  { %775 = vrot.lane.b32.xlu0 %v773_v14, %s1143_s12 }
 0xe8e   :  { %v392_v43 = vpop.f32.mrf.mxu2 }
 0xe8f   :  { %v393_v45 = vadd.f32 %v1376_v3, %v392_v43 }
 0xed8   :  { %v776_v17 = vpop.permute.xlu0 %775 }
 0xed9   :  { %v778_v18 = vadd.f32 %v776_v17, %v768_v16 }
 0xedb   :  { %1123 = vtanh.f32 %v778_v18 }
 0xee1   :  { %v1124_v19 = vpop.eup %1123 }
 0xee2   :  { %781 = vrot.lane.b32.xlu1 %v1124_v19, %s1142_s5 }
 0xf54   :  { %v782_v23 = vpop.permute.xlu1 %781 }
 0xf55   :  { %v784_v24 = vmul.f32 %v782_v23, %v765_v13 }
 0xf57   :  { %786 = vrot.lane.b32.xlu2 %v784_v24, %s1143_s12 }
 0xfb1   :  { %v787_v25 = vpop.permute.xlu2 %786 }
 0xfb2   :  { %789 = vst.msk [vmem:[#allocation2 + $0x28] sm:$0xff] %vm329_vm8, %v787_v25  ;;  %1055 = vmatmul.msk.f32.vlgmr.msra.gmra.mxu1 %vm329_vm8, %v787_v25 }
 0xfb9   :  { %v925_v26 = vld [vmem:[#allocation2 + $0x28] sm:$0xff] }
 0xfba   :  { %1064 = vmatmul.msk.f32.gmra.mxu3 %vm329_vm8, %v925_v26 }
0x102f   :  { %v809_v29 = vpop.f32.mrf.mxu1 }
0x1030   :  { %v812_v40 = vadd.f32 %v809_v29, %v390_v28 }
0x1032   :  { %1125 = vtanh.f32 %v812_v40  ;;  %v1056_v33 = vmul.f32 -1.442695, %v812_v40 }
0x1034   :  { %1127 = vpow2.f32 %v1056_v33 }
0x1038   :  { %v1126_v30 = vpop.eup %1125 }
0x1039   :  { %835 = vrot.lane.b32.xlu0 %v1126_v30, %s1142_s5 }
0x103a   :  { %v1128_v34 = vpop.eup %1127 }
0x103b   :  { %v816_v35 = vadd.f32 1.0, %v1128_v34 }
0x103d   :  { %v992_v31 = vpop.f32.mrf.mxu3  ;;  %1129 = vrcp.f32 %v816_v35  ;;  %v828_v47 = vand.u32 2147483648, %v816_v35  ;;  %vm822_vm6 = vweird.f32 %v816_v35  ;;  %v826_v48 = vand.u32 2147483647, %v816_v35 }
0x103e   :  { %v993_v32 = vadd.f32 %v1428_v51, %v992_v31 }
0x103f   :  { %v829_v52 = vor.u32 1.1754944e-38, %v828_v47  ;;  %vm827_vm10 = vcmp.eq.f32.partialorder %v826_v48, 8.507059e+37 }
0x1040   :  { %1007 = vst.msk [vmem:[%s1573_s15 + $0x28] sm:$0xff] %vm1001_vm13, %v993_v32 }
0x1043   :  { %v1130_v36 = vpop.eup %1129 }
0x1044   :  { %v818_v37 = vmul.f32 %v1130_v36, %v816_v35  ;;  %vm823_vm5 = vweird.f32 %v1130_v36 }
0x1045   :  { %vm824_vm9 = vmor %vm822_vm6, %vm823_vm5 }
0x1046   :  { %v819_v38 = vsub.f32 1.0, %v818_v37 }
0x1048   :  { %v820_v41 = vmul.f32 %v1130_v36, %v819_v38 }
0x104a   :  { %v821_v44 = vadd.f32 %v1130_v36, %v820_v41 }
0x104c   :  { %v825_v50 = vsel %vm824_vm9, %v1130_v36, %v821_v44 }
0x104d   :  { %v830_v54 = vsel %vm827_vm10, %v829_v52, %v825_v50 }
0x104e   :  { %v833_v57 = vmul.f32 %v830_v54, %v778_v18 }
0x10ab   :  { %v836_v53 = vpop.permute.xlu0 %835 }
0x10ac   :  { %v838_v55 = vmul.f32 %v836_v53, %v830_v54 }
0x10ae   :  { %840 = vrot.lane.b32.xlu1 %v838_v55, %s1143_s12 }
0x1120   :  { %v841_v58 = vpop.permute.xlu1 %840 }
0x1121   :  { %v843_v59 = vadd.f32 %v841_v58, %v833_v57 }
0x1123   :  { %1131 = vtanh.f32 %v843_v59 }
0x1129   :  { %v1132_v60 = vpop.eup %1131 }
0x112a   :  { %846 = vrot.lane.b32.xlu2 %v1132_v60, %s1142_s5 }
0x1184   :  { %v847_v39 = vpop.permute.xlu2 %846 }
0x1185   :  { %v849_v61 = vmul.f32 %v847_v39, %v830_v54 }
0x1187   :  { %851 = vrot.lane.b32.xlu0 %v849_v61, %s1143_s12 }
0x11f9   :  { %v852_v1 = vpop.permute.xlu0 %851 }
0x11fa   :  { %854 = vst.msk [vmem:[#allocation2 + $0x30] sm:$0xff] %vm329_vm8, %v852_v1  ;;  %1057 = vmatmul.msk.f32.vlgmr.msrb.gmra.mxu1 %vm329_vm8, %v852_v1 }
0x1201   :  { %v926_v42 = vld [vmem:[#allocation2 + $0x30] sm:$0xff] }
0x1202   :  { %1065 = vmatmul.msk.f32.gmra.mxu3 %vm329_vm8, %v926_v42 }
0x1277   :  { %v874_v46 = vpop.f32.mrf.mxu1 }
0x1278   :  { %v877_v2 = vadd.f32 %v874_v46, %v393_v45 }
0x127a   :  { %1133 = vtanh.f32 %v877_v2  ;;  %v1058_v6 = vmul.f32 -1.442695, %v877_v2 }
0x127c   :  { %1135 = vpow2.f32 %v1058_v6 }
0x1280   :  { %v1134_v4 = vpop.eup %1133 }
0x1281   :  { %900 = vrot.lane.b32.xlu1 %v1134_v4, %s1142_s5 }
0x1282   :  { %v1136_v7 = vpop.eup %1135 }
0x1283   :  { %v881_v8 = vadd.f32 1.0, %v1136_v7 }
0x1285   :  { %v995_v49 = vpop.f32.mrf.mxu3  ;;  %1137 = vrcp.f32 %v881_v8  ;;  %v893_v13 = vand.u32 2147483648, %v881_v8  ;;  %vm887_vm11 = vweird.f32 %v881_v8  ;;  %v891_v14 = vand.u32 2147483647, %v881_v8 }
0x1286   :  { %v996_v5 = vadd.f32 %v1428_v51, %v995_v49 }
0x1287   :  { %v894_v16 = vor.u32 1.1754944e-38, %v893_v13  ;;  %vm892_vm14 = vcmp.eq.f32.partialorder %v891_v14, 8.507059e+37 }
0x1288   :  { %1008 = vst.msk [vmem:[%s1573_s15 + $0x30] sm:$0xff] %vm1001_vm13, %v996_v5 }
0x128b   :  { %v1138_v3 = vpop.eup %1137 }
0x128c   :  { %v883_v9 = vmul.f32 %v1138_v3, %v881_v8  ;;  %vm888_vm7 = vweird.f32 %v1138_v3 }
0x128d   :  { %vm889_vm12 = vmor %vm887_vm11, %vm888_vm7 }
0x128e   :  { %v884_v10 = vsub.f32 1.0, %v883_v9 }
0x1290   :  { %v885_v11 = vmul.f32 %v1138_v3, %v884_v10 }
0x1292   :  { %v886_v12 = vadd.f32 %v1138_v3, %v885_v11 }
0x1294   :  { %v890_v15 = vsel %vm889_vm12, %v1138_v3, %v886_v12 }
0x1295   :  { %v895_v18 = vsel %vm892_vm14, %v894_v16, %v890_v15 }
0x1296   :  { %v898_v20 = vmul.f32 %v895_v18, %v843_v59 }
0x12f3   :  { %v901_v17 = vpop.permute.xlu1 %900 }
0x12f4   :  { %v903_v19 = vmul.f32 %v901_v17, %v895_v18 }
0x12f6   :  { %905 = vrot.lane.b32.xlu2 %v903_v19, %s1143_s12 }
0x1350   :  { %v906_v21 = vpop.permute.xlu2 %905 }
0x1351   :  { %v908_v22 = vadd.f32 %v906_v21, %v898_v20 }
0x1353   :  { %1139 = vtanh.f32 %v908_v22 }
0x1359   :  { %v1140_v23 = vpop.eup %1139 }
0x135a   :  { %911 = vrot.lane.b32.xlu0 %v1140_v23, %s1142_s5 }
0x13cc   :  { %v912_v24 = vpop.permute.xlu0 %911 }
0x13cd   :  { %v914_v25 = vmul.f32 %v912_v24, %v895_v18 }
0x13cf   :  { %916 = vrot.lane.b32.xlu1 %v914_v25, %s1143_s12 }
0x1441   :  { %v917_v26 = vpop.permute.xlu1 %916 }
0x1442   :  { %919 = vst.msk [vmem:[#allocation2 + $0x38] sm:$0xff] %vm329_vm8, %v917_v26 }
0x1449   :  { %v927_v27 = vld [vmem:[#allocation2 + $0x38] sm:$0xff] }
0x144a   :  { %1066 = vmatmul.msk.f32.gmra.mxu3 %vm329_vm8, %v927_v27 }
0x14cd   :  { %v998_v28 = vpop.f32.mrf.mxu3 }
0x14ce   :  { %v999_v29 = vadd.f32 %v1428_v51, %v998_v28 }
0x14d0   :  { %1009 = vst.msk [vmem:[%s1573_s15 + $0x38] sm:$0xff] %vm1001_vm13, %v999_v29 }

</bundles_post_ra>
